<compile_context>
chip_gen: v7x
topology: tpu7x:2x2x1
jax: 0.10.0
libtpu: 0.0.40
codegen_flags: <defaults>
</compile_context>

<pallas_src>
import functools

import jax
import jax.numpy as jnp
from jax.experimental import pallas as pl
from jax.experimental.pallas import tpu as pltpu


def _detect_level_kernel(x_ref, w_ref, const_ref, grid_ref, raw_ref, z_ref, *,
                         no, two_stride):
    """Fused 1x1-conv + bias + sigmoid + YOLO box decode for one (b, hw-tile).

    x_ref:     (C, t_hw)  bf16 input pixels (NCHW slab; lanes = spatial)
    w_ref:     (N, C)     bf16 conv weight, N = na*no
    const_ref: (N, 2)     f32 per-row constants: [:,0]=bias, [:,1]=4*anchor*stride
    grid_ref:  (2, t_hw)  f32 precomputed [(gx-0.5)*stride ; (gy-0.5)*stride]
    raw_ref:   (N, t_hw)  f32 raw conv output (pre-sigmoid, matches torch x[i])
    z_ref:     (N, t_hw)  f32 decoded output (xy, wh, conf/cls)
    """
    n_rows = w_ref.shape[0]

    acc = jnp.dot(w_ref[...], x_ref[...], preferred_element_type=jnp.float32)
    acc = acc + const_ref[:, 0:1]                       # bias (lane broadcast)
    raw_ref[...] = acc

    # sigmoid: keep both the exp and the reciprocal on the EUP slot.
    y = pl.reciprocal(1.0 + jnp.exp(-acc), approx=True)

    # Per-row output-channel index c = row % no (no is a compile-time const).
    c = jax.lax.broadcasted_iota(jnp.int32, (n_rows, 1), 0) % no

    # grid_val is only consumed where is_xy holds; the final where masks the
    # gy filler on conf/class rows.  Rows already scaled by stride.
    grid_val = jnp.where(c == 0, grid_ref[0:1, :], grid_ref[1:2, :])  # (N, t_hw)
    xy = y * two_stride + grid_val                      # (y*2 + g - 0.5) * stride
    wh = y * y * const_ref[:, 1:2]                      # (y*2)^2 * anchor*stride

    is_xy = c < 2
    is_wh = jnp.logical_and(c >= 2, c < 4)
    z_ref[...] = jnp.where(is_xy, xy, jnp.where(is_wh, wh, y))


def _pick_hw_tile(HW, C, N):
    """Spatial (lane) tile size: the whole level when its double-buffered
    working set fits comfortably in scoped VMEM (conservative enough for
    v7x's 64 MiB), else the largest multiple-of-128 tile that does."""
    budget = 12 << 20
    # 2 bufs x (bf16 in + 2 f32 outs + 2-row f32 grid) per spatial column.
    per_col = 2 * (C * 2 + 2 * N * 4 + 2 * 4)
    fixed = 2 * (N * C * 2 + N * 2 * 4)     # weight + row constants
    if fixed + per_col * HW <= budget:
        return HW                           # one lane-dense block per image
    t = ((budget - fixed) // per_col) // 128 * 128
    return max(128, min(t, (HW // 128) * 128))


def _detect_level(x3, w, row_const, grid_rows, *, no, stride):
    """x3: (bs, C, ny*nx) bf16; w: (N, C) bf16; row_const: (N, 2) f32;
    grid_rows: (2, ny*nx) f32 (already multiplied by stride)."""
    bs, C, HW = x3.shape
    N = w.shape[0]
    t_hw = _pick_hw_tile(HW, C, N)
    kernel = functools.partial(_detect_level_kernel, no=no,
                               two_stride=2.0 * float(stride))
    return pl.pallas_call(
        kernel,
        out_shape=(jax.ShapeDtypeStruct((bs, N, HW), jnp.float32),
                   jax.ShapeDtypeStruct((bs, N, HW), jnp.float32)),
        grid_spec=pltpu.PrefetchScalarGridSpec(
            num_scalar_prefetch=0,
            # Grid = (batch, spatial tiles); both independent ("parallel").
            # With bs >= 2 there are always >= 2 parallel blocks per level, so
            # both TensorCores of a v7x chip stay busy even when a whole level
            # fits in a single spatial tile.
            grid=(bs, pl.cdiv(HW, t_hw)),
            in_specs=[pl.BlockSpec((None, C, t_hw), lambda b, h: (b, 0, h)),
                      pl.BlockSpec((N, C), lambda b, h: (0, 0)),
                      pl.BlockSpec((N, 2), lambda b, h: (0, 0)),
                      pl.BlockSpec((2, t_hw), lambda b, h: (0, h))],
            out_specs=[pl.BlockSpec((None, N, t_hw), lambda b, h: (b, 0, h)),
                       pl.BlockSpec((None, N, t_hw), lambda b, h: (b, 0, h))]),
        compiler_params=pltpu.CompilerParams(
            dimension_semantics=("parallel", "parallel")),
    )(x3, w, row_const, grid_rows)


class Detect:
    """JAX/Pallas re-implementation of the YOLOv5 Detect head (inference mode)."""

    def __init__(self, nc, anchors, ch, stride, key):
        self.nc = nc
        self.no = nc + 5
        self.nl = len(anchors)
        self.na = len(anchors[0]) // 2
        self.anchors = jnp.asarray(anchors, jnp.float32).reshape(self.nl, self.na, 2)
        self.stride = jnp.asarray(stride, jnp.float32)
        self._stride_f = tuple(float(s) for s in stride)
        self._grid_cache = {}                                # (i, ny, nx) -> (2, HW) f32
        N = self.na * self.no

        self.weights, self.weights_bf16, self.biases, self.row_consts = [], [], [], []
        keys = jax.random.split(key, 2 * self.nl)
        for i, c in enumerate(ch):
            # nn.Conv2d(c, no*na, 1) -> weight (no*na, c, 1, 1), bias (no*na,)
            w = jax.random.normal(keys[2 * i], (N, c), jnp.float32) * 0.05
            b = jax.random.normal(keys[2 * i + 1], (N,), jnp.float32) * 0.05
            self.weights.append(w)
            self.weights_bf16.append(w.astype(jnp.bfloat16))   # kernel-side cast, done once
            self.biases.append(b)
            # Fold bias + per-row 4*anchor*stride into one small constant
            # operand (replaces per-element scalar muls inside the kernel).
            j = jnp.arange(N)
            c_idx = j % self.no
            a_idx = j // self.no
            comp = jnp.clip(c_idx - 2, 0, 1)                   # anchor component (w or h)
            anc = 4.0 * self.anchors[i][a_idx, comp] * self._stride_f[i]
            anc = jnp.where((c_idx >= 2) & (c_idx < 4), anc, 0.0)
            self.row_consts.append(jnp.stack([b, anc], axis=1).astype(jnp.float32))

    def _grid_rows(self, i, ny, nx):
        """Cached (2, ny*nx) rows: [(gx-0.5)*stride ; (gy-0.5)*stride]
        (mirrors PyTorch's lazily cached self.grid[i])."""
        key = (i, ny, nx)
        g = self._grid_cache.get(key)
        if g is None:
            yv, xv = jnp.meshgrid(jnp.arange(ny, dtype=jnp.float32),
                                  jnp.arange(nx, dtype=jnp.float32), indexing='ij')
            s = self._stride_f[i]
            g = jnp.stack([(xv.reshape(-1) - 0.5) * s,
                           (yv.reshape(-1) - 0.5) * s], axis=0)    # (2, HW)
            self._grid_cache[key] = g
        return g

    def __call__(self, xs):
        z, x_out = [], []
        for i, x in enumerate(xs):                              # x: NCHW
            bs, C, ny, nx = x.shape
            HW = ny * nx
            # (bs, C, ny, nx) -> (bs, C, HW) is a free view; bf16 halves the
            # kernel's input DMA (in a full network the backbone already emits
            # bf16, so this cast fuses away).
            x3 = x.reshape(bs, C, HW).astype(jnp.bfloat16)

            raw, zlvl = _detect_level(x3, self.weights_bf16[i], self.row_consts[i],
                                      self._grid_rows(i, ny, nx),
                                      no=self.no, stride=self._stride_f[i])

            # (bs, na*no, HW) is exactly the NCHW conv-output layout; replicate
            # the PyTorch view/permute to (bs, na, ny, nx, no).
            raw5 = raw.reshape(bs, self.na, self.no, ny, nx).transpose(0, 1, 3, 4, 2)
            z5 = zlvl.reshape(bs, self.na, self.no, ny, nx).transpose(0, 1, 3, 4, 2)
            x_out.append(raw5)                                  # (bs, na, ny, nx, no)
            z.append(z5.reshape(bs, self.na * HW, self.no))
        # training=False, export=False -> (cat(z, 1), x)
        return jnp.concatenate(z, axis=1), x_out


def _reference(det, xs):
    """Pure-JAX reference reproducing the PyTorch forward (on the same
    bf16-rounded operands as the kernel path, so the check stays tight)."""
    z, xo = [], []
    for i, x in enumerate(xs):
        bs, C, ny, nx = x.shape
        xr = x.astype(jnp.bfloat16).astype(jnp.float32)
        wr = det.weights_bf16[i].astype(jnp.float32)
        o = jnp.einsum('bchw,nc->bnhw', xr, wr, precision=jax.lax.Precision.HIGHEST)
        o = o + det.biases[i][None, :, None, None]
        o = o.reshape(bs, det.na, det.no, ny, nx).transpose(0, 1, 3, 4, 2)
        xo.append(o)
        y = jax.nn.sigmoid(o)
        yv, xv = jnp.meshgrid(jnp.arange(ny, dtype=jnp.float32),
                              jnp.arange(nx, dtype=jnp.float32), indexing='ij')
        grid = jnp.stack((xv, yv), -1)[None, None] - 0.5
        anchor_grid = (det.anchors[i] * det.stride[i]).reshape(1, det.na, 1, 1, 2)
        xy = (y[..., :2] * 2 + grid) * det.stride[i]
        wh = (y[..., 2:4] * 2) ** 2 * anchor_grid
        yy = jnp.concatenate((xy, wh, y[..., 4:]), -1)
        z.append(yy.reshape(bs, det.na * ny * nx, det.no))
    return jnp.concatenate(z, 1), xo


if __name__ == "__main__":
    key = jax.random.PRNGKey(0)
    k_in0, k_in1, k_par = jax.random.split(key, 3)

    nc = 3                                                  # small class count -> no = 8
    anchors = ((10, 13, 16, 30, 33, 23),
               (30, 61, 62, 45, 59, 119))                   # nl = 2, na = 3
    ch = (16, 32)
    stride = (8.0, 16.0)

    det = Detect(nc, anchors, ch, stride, k_par)

    # NCHW inputs, two feature levels.
    x0 = jax.random.normal(k_in0, (2, 16, 16, 16), jnp.float32)   # bs=2, C=16, 16x16
    x1 = jax.random.normal(k_in1, (2, 32, 8, 8), jnp.float32)     # bs=2, C=32, 8x8

    z, x_out = det([x0, x1])
    jax.block_until_ready(z)
    for t in x_out:
        jax.block_until_ready(t)

    z_ref, x_ref = _reference(det, [x0, x1])
    assert z.shape == z_ref.shape == (2, 3 * (16 * 16 + 8 * 8), 8)
    assert all(a.shape == b.shape for a, b in zip(x_out, x_ref))
    # 2e-2 tolerance covers the approximate EUP reciprocal used for the
    # sigmoid; the matmul operands are identically bf16-rounded in both paths.
    assert jnp.allclose(z, z_ref, atol=2e-2, rtol=2e-2)
    assert all(jnp.allclose(a, b, atol=2e-2, rtol=2e-2) for a, b in zip(x_out, x_ref))

    print("KERNEL_OK")
</pallas_src>

<mosaic_0001>
module attributes {stable_mosaic.version = 11 : i64} {
  func.func @_detect_level_kernel(%arg0: i32, %arg1: i32, %arg2: memref<1x16x256xbf16, #tpu.memory_space<vmem>>, %arg3: memref<24x16xbf16, #tpu.memory_space<vmem>>, %arg4: memref<24x2xf32, #tpu.memory_space<vmem>>, %arg5: memref<2x256xf32, #tpu.memory_space<vmem>>, %arg6: memref<1x24x256xf32, #tpu.memory_space<vmem>>, %arg7: memref<1x24x256xf32, #tpu.memory_space<vmem>>) attributes {dimension_semantics = [#tpu.dimension_semantics<parallel>, #tpu.dimension_semantics<parallel>], iteration_bounds = array<i64: 2, 1>, scalar_prefetch = 0 : i64, scratch_operands = 0 : i64, tpu.core_type = #tpu.core_type<tc>, window_params = [{transform_indices = @transform_0, window_bounds = array<i64: 1, 16, 256>}, {pipeline_mode = #tpu.pipeline_mode<synchronous>, transform_indices = @transform_1, window_bounds = array<i64: 24, 16>}, {pipeline_mode = #tpu.pipeline_mode<synchronous>, transform_indices = @transform_2, window_bounds = array<i64: 24, 2>}, {transform_indices = @transform_3, window_bounds = array<i64: 2, 256>}, {transform_indices = @transform_4, window_bounds = array<i64: 1, 24, 256>}, {transform_indices = @transform_5, window_bounds = array<i64: 1, 24, 256>}]} {
    %c0 = arith.constant 0 : index
    %c0_0 = arith.constant 0 : index
    %0 = vector.load %arg3[%c0, %c0_0] : memref<24x16xbf16, #tpu.memory_space<vmem>>, vector<24x16xbf16>
    %c0_1 = arith.constant 0 : index
    %c0_2 = arith.constant 0 : index
    %c0_3 = arith.constant 0 : index
    %1 = vector.load %arg2[%c0_1, %c0_2, %c0_3] : memref<1x16x256xbf16, #tpu.memory_space<vmem>>, vector<1x16x256xbf16>
    %2 = vector.shape_cast %1 : vector<1x16x256xbf16> to vector<16x256xbf16>
    %cst = arith.constant dense<0.000000e+00> : vector<24x256xf32>
    %3 = tpu.matmul %0, %2, %cst {dimension_numbers = #tpu.dot_dimension_numbers<[1], [0], [0], [1], [0, 0, 1, 1], [], []>} : vector<24x16xbf16>, vector<16x256xbf16>, vector<24x256xf32> -> vector<24x256xf32>
    %c0_4 = arith.constant 0 : index
    %c0_5 = arith.constant 0 : index
    %4 = vector.load %arg4[%c0_4, %c0_5] : memref<24x2xf32, #tpu.memory_space<vmem>>, vector<24x1xf32>
    %5 = vector.broadcast %4 : vector<24x1xf32> to vector<24x256xf32>
    %6 = arith.addf %3, %5 : vector<24x256xf32>
    %c0_6 = arith.constant 0 : index
    %c0_7 = arith.constant 0 : index
    %c0_8 = arith.constant 0 : index
    %7 = vector.load %arg6[%c0_6, %c0_7, %c0_8] : memref<1x24x256xf32, #tpu.memory_space<vmem>>, vector<1x24x256xf32>
    %8 = vector.shape_cast %7 : vector<1x24x256xf32> to vector<24x256xf32>
    %9 = vector.shape_cast %6 : vector<24x256xf32> to vector<1x24x256xf32>
    tpu.vector_store %arg6[%c0_6, %c0_7, %c0_8], %9 {strides = array<i32>} : memref<1x24x256xf32, #tpu.memory_space<vmem>>, vector<1x24x256xf32>,
    %cst_9 = arith.constant 0.000000e+00 : f32
    %10 = vector.broadcast %cst_9 : f32 to vector<24x256xf32>
    %11 = arith.subf %10, %6 : vector<24x256xf32>
    %12 = math.exp %11 : vector<24x256xf32>
    %cst_10 = arith.constant 1.000000e+00 : f32
    %13 = vector.broadcast %cst_10 : f32 to vector<24x256xf32>
    %14 = arith.addf %13, %12 : vector<24x256xf32>
    %15 = tpu.reciprocal %14 {approx = true} : vector<24x256xf32> -> vector<24x256xf32>
    %16 = tpu.iota {dimensions = array<i32: 0>} : vector<24x1xi32>
    %c8_i32 = arith.constant 8 : i32
    %c0_i32 = arith.constant 0 : i32
    %17 = arith.cmpi eq, %c8_i32, %c0_i32 : i32
    %c1_i32 = arith.constant 1 : i32
    %18 = arith.select %17, %c1_i32, %c8_i32 : i32
    %19 = vector.broadcast %18 : i32 to vector<24x1xi32>
    %20 = arith.remsi %16, %19 : vector<24x1xi32>
    %c0_i32_11 = arith.constant 0 : i32
    %21 = vector.broadcast %c0_i32_11 : i32 to vector<24x1xi32>
    %22 = arith.cmpi ne, %20, %21 : vector<24x1xi32>
    %c0_i32_12 = arith.constant 0 : i32
    %23 = vector.broadcast %c0_i32_12 : i32 to vector<24x1xi32>
    %24 = arith.cmpi slt, %20, %23 : vector<24x1xi32>
    %c0_i32_13 = arith.constant 0 : i32
    %25 = arith.cmpi slt, %18, %c0_i32_13 : i32
    %26 = vector.broadcast %25 : i1 to vector<24x1xi1>
    %27 = vector.broadcast %26 : vector<24x1xi1> to vector<24x1xi1>
    %28 = arith.xori %24, %27 : vector<24x1xi1>
    %29 = arith.andi %28, %22 : vector<24x1xi1>
    %30 = vector.broadcast %18 : i32 to vector<24x1xi32>
    %31 = arith.addi %20, %30 : vector<24x1xi32>
    %32 = arith.select %29, %31, %20 : vector<24x1xi1>, vector<24x1xi32>
    %c0_i32_14 = arith.constant 0 : i32
    %33 = vector.broadcast %c0_i32_14 : i32 to vector<24x1xi32>
    %34 = arith.cmpi eq, %32, %33 : vector<24x1xi32>
    %c0_15 = arith.constant 0 : index
    %c0_16 = arith.constant 0 : index
    %35 = vector.load %arg5[%c0_15, %c0_16] : memref<2x256xf32, #tpu.memory_space<vmem>>, vector<1x256xf32>
    %c1 = arith.constant 1 : index
    %c0_17 = arith.constant 0 : index
    %36 = vector.load %arg5[%c1, %c0_17] : memref<2x256xf32, #tpu.memory_space<vmem>>, vector<1x256xf32>
    %37 = vector.shape_cast %34 : vector<24x1xi1> to vector<24x1xi1>
    %38 = vector.broadcast %37 : vector<24x1xi1> to vector<24x256xi1>
    %39 = vector.shape_cast %35 : vector<1x256xf32> to vector<1x256xf32>
    %40 = vector.broadcast %39 : vector<1x256xf32> to vector<24x256xf32>
    %41 = vector.shape_cast %36 : vector<1x256xf32> to vector<1x256xf32>
    %42 = vector.broadcast %41 : vector<1x256xf32> to vector<24x256xf32>
    %43 = arith.select %38, %40, %42 : vector<24x256xi1>, vector<24x256xf32>
    %cst_18 = arith.constant 1.600000e+01 : f32
    %44 = vector.broadcast %cst_18 : f32 to vector<24x256xf32>
    %45 = arith.mulf %15, %44 : vector<24x256xf32>
    %46 = arith.addf %45, %43 : vector<24x256xf32>
    %47 = arith.mulf %15, %15 : vector<24x256xf32>
    %c0_19 = arith.constant 0 : index
    %c1_20 = arith.constant 1 : index
    %48 = vector.load %arg4[%c0_19, %c1_20] : memref<24x2xf32, #tpu.memory_space<vmem>>, vector<24x1xf32>
    %49 = vector.broadcast %48 : vector<24x1xf32> to vector<24x256xf32>
    %50 = arith.mulf %47, %49 : vector<24x256xf32>
    %c2_i32 = arith.constant 2 : i32
    %51 = vector.broadcast %c2_i32 : i32 to vector<24x1xi32>
    %52 = arith.cmpi slt, %32, %51 : vector<24x1xi32>
    %c2_i32_21 = arith.constant 2 : i32
    %53 = vector.broadcast %c2_i32_21 : i32 to vector<24x1xi32>
    %54 = arith.cmpi sge, %32, %53 : vector<24x1xi32>
    %c4_i32 = arith.constant 4 : i32
    %55 = vector.broadcast %c4_i32 : i32 to vector<24x1xi32>
    %56 = arith.cmpi slt, %32, %55 : vector<24x1xi32>
    %57 = arith.andi %54, %56 : vector<24x1xi1>
    %58 = vector.shape_cast %57 : vector<24x1xi1> to vector<24x1xi1>
    %59 = vector.broadcast %58 : vector<24x1xi1> to vector<24x256xi1>
    %60 = arith.select %59, %50, %15 : vector<24x256xi1>, vector<24x256xf32>
    %61 = vector.shape_cast %52 : vector<24x1xi1> to vector<24x1xi1>
    %62 = vector.broadcast %61 : vector<24x1xi1> to vector<24x256xi1>
    %63 = arith.select %62, %46, %60 : vector<24x256xi1>, vector<24x256xf32>
    %c0_22 = arith.constant 0 : index
    %c0_23 = arith.constant 0 : index
    %c0_24 = arith.constant 0 : index
    %64 = vector.load %arg7[%c0_22, %c0_23, %c0_24] : memref<1x24x256xf32, #tpu.memory_space<vmem>>, vector<1x24x256xf32>
    %65 = vector.shape_cast %64 : vector<1x24x256xf32> to vector<24x256xf32>
    %66 = vector.shape_cast %63 : vector<24x256xf32> to vector<1x24x256xf32>
    tpu.vector_store %arg7[%c0_22, %c0_23, %c0_24], %66 {strides = array<i32>} : memref<1x24x256xf32, #tpu.memory_space<vmem>>, vector<1x24x256xf32>,
    return
  }
  func.func @transform_0(%arg0: i32, %arg1: i32) -> (i32, i32, i32) {
    %c0_i32 = arith.constant 0 : i32
    %c0_i32_0 = arith.constant 0 : i32
    return %arg0, %c0_i32, %arg1 : i32, i32, i32
  }
  func.func @transform_1(%arg0: i32, %arg1: i32) -> (i32, i32) {
    %c0_i32 = arith.constant 0 : i32
    %c0_i32_0 = arith.constant 0 : i32
    %c0_i32_1 = arith.constant 0 : i32
    return %c0_i32, %c0_i32_0 : i32, i32
  }
  func.func @transform_2(%arg0: i32, %arg1: i32) -> (i32, i32) {
    %c0_i32 = arith.constant 0 : i32
    %c0_i32_0 = arith.constant 0 : i32
    %c0_i32_1 = arith.constant 0 : i32
    return %c0_i32, %c0_i32_0 : i32, i32
  }
  func.func @transform_3(%arg0: i32, %arg1: i32) -> (i32, i32) {
    %c0_i32 = arith.constant 0 : i32
    %c0_i32_0 = arith.constant 0 : i32
    return %c0_i32, %arg1 : i32, i32
  }
  func.func @transform_4(%arg0: i32, %arg1: i32) -> (i32, i32, i32) {
    %c0_i32 = arith.constant 0 : i32
    %c0_i32_0 = arith.constant 0 : i32
    return %arg0, %c0_i32, %arg1 : i32, i32, i32
  }
  func.func @transform_5(%arg0: i32, %arg1: i32) -> (i32, i32, i32) {
    %c0_i32 = arith.constant 0 : i32
    %c0_i32_0 = arith.constant 0 : i32
    return %arg0, %c0_i32, %arg1 : i32, i32, i32
  }
}

</mosaic_0001>

<bundles_post_ra>
// kernel: tpu_custom_call.1
= control target key start
LH: loop header
LB: loop body
LE: loop exit
PB: predicated region body
PF: predicated region fallthrough
CT: control target
= control target key end

     0   :  { %11 = vsyncpa [#allocation3], 0  ;;  %s1279_s0 = inlined_call_operand.vmem [shape: bf16[2,16,256], index: 0, kind: input, shape index: {}]   ;;  %s1280_s1 = inlined_call_operand.vmem [shape: bf16[24,16], index: 1, kind: input, shape index: {}]   ;;  %s1281_s2 = inlined_call_operand.vmem [shape: f32[24,2], index: 2, kind: input, shape index: {}]   ;;  %s1282_s3 = inlined_call_operand.vmem [shape: f32[2,256], index: 3, kind: input, shape index: {}]   ;;  %s1283_s4 = inlined_call_operand.hbm [shape: f32[2,24,256], index: 4, kind: output, shape index: {0}]   ;;  %s1284_s5 = inlined_call_operand.hbm [shape: f32[2,24,256], index: 5, kind: output, shape index: {1}]  }
   0x1   :  { %13 = vsyncpa [#allocation3 + $0x1], 0 }
   0x2   :  { %14 = vsyncpa [#allocation5], 0 }
   0x3   :  { %16 = vsyncpa [#allocation5 + $0x1], 0  ;;  %s1028_s18 = smov 0   ;;  %s1030_s19 = smov 0  }
   0x4   :  { %s1032_s20 = smov 0   ;;  %s1034_s21 = smov 0  }
   0x5   :  { %s1036_s22 = smov 0   ;;  %s1038_s23 = smov 0  }
   0x6 LB: > { %s758_s24 = sadd.s32 4294967295, %s990_s23   ;;  %s759_s25 = sadd.s32 4294967294, %s990_s23   ;;  %s990_s23 = sphi %s1038_s23, %s22_s23   ;;  %s986_s22 = sphi %s1036_s22, %s1295_s22   ;;  %s982_s21 = sphi %s1034_s21, %s1294_s21   ;;  %s978_s20 = sphi %s1032_s20, %s1293_s20   ;;  %s974_s19 = sphi %s1030_s19, %s1292_s19   ;;  %s970_s18 = sphi %s1028_s18, %s1291_s18  }
   0x7   : > { %s34_s26 = sadd.s32 1, %s986_s22  ;;  %s139_s27 = sadd.s32 1, %s978_s20 }
   0x8   : > { %p36_p0 = scmp.ge.s32.totalorder %s34_s26, 2  ;;  %p149_p1 = scmp.ne.s32.totalorder %s978_s20, %s974_s19 }
   0x9   : > { %p150_p2 = scmp.eq.s32.totalorder %s758_s24, 1  ;;  %p155_p3 = scmp.ne.s32.totalorder %s974_s19, %s970_s18 }
   0xa   : > { %s1297_s26 = smov (%p36_p0, %s34_s26), 0  ;;  %p156_p5 = scmp.eq.s32.totalorder %s759_s25, 1 }
   0xb   : > { %p1068_p4 = por %p150_p2, %p149_p1  ;;  %s134_s29 = ssub.s32 %s986_s22, %s1297_s26 }
   0xc   : > { %p763_p6 = scmp.ge.s32.totalorder %s990_s23, 1  ;;  %p137_p7 = scmp.eq.s32.totalorder %s134_s29, 0 }
   0xd   : > { %p1075_p8 = por %p156_p5, %p155_p3  ;;  %p230_p9 = scmp.lt.s32.totalorder %s990_s23, 3 }
   0xe   : > { %s1081_s6 = scalar_select %p137_p7, %s978_s20, %s139_s27  }
   0xf   : > { %p231_p10 = pnand %p763_p6, %p230_p9 }
  0x10   : > { %p273_p11 = scmp.lt.s32.totalorder (!%p231_p10), %s982_s21, 1  ;;  %v992_v0 = vmov (!%p231_p10), 0   ;;  %v296_v1 = vld [vmem:[%s1281_s2] sm:$0xff] (!%p231_p10)  ;;  %v298_v2 = vld [vmem:[%s1281_s2 + $0x10] sm:$0xff] (!%p231_p10)  ;;  %v297_v3 = vld [vmem:[%s1281_s2 + $0x8] sm:$0xff] (!%p231_p10)  ;;  %v993_v6 = vmov (!%p231_p10), 1  }
  0x11   : > { %234 = sbr.rel (%p231_p10) target bundleno = 313 (0x139), region = 36  ;;  %371 = vmatprep.mubr.bf16.mxu0 (!%p231_p10), %v992_v0  ;;  %381 = vmatprep.mubr.bf16.mxu1 (!%p231_p10), %v992_v0  ;;  %v854_v7 = vld [vmem:[%s1280_s1] sm:$0xff] (!%p231_p10)   ;;  %v855_v8 = vld [vmem:[%s1280_s1 + $0x8] ss:$0 sps:$4 sm:$0xff] (!%p231_p10)   ;;  %vm332_vm0 = vcmask (!%p231_p10), 130048  }
  0x12   : > { %847 = vset.pattern.permute.xlu0 (!%p231_p10), %v992_v0  ;;  %848 = vset.pattern.permute.xlu1 (!%p231_p10), %v992_v0  ;;  %s781_s11 = smul.u32 (!%p231_p10), 768, %s982_s21 }
  0x13   : > { %301 = vperm.xlu0 (!%p231_p10), %847, %v296_v1   ;;  %311 = vperm.xlu1 (!%p231_p10), %848, %v298_v2  }
  0x14   : > { %s1124_s14 = scalar_lea.hbm (!%p231_p10), %s1283_s4, %s781_s11 }
  0x17   : > { %306 = vperm.xlu0 (!%p231_p10), %847, %v297_v3   ;;  %849 = vset.pattern.permute.xlu1 (!%p231_p10), %v993_v6 }
  0x18   : > { %s274_s7 = scalar_select %p273_p11, %s982_s21, 1  ;;  %529 = vperm.xlu1 %849, %v296_v1  }
  0x1a   : > { %s777_s12 = sshll.u32 %s274_s7, 4  ;;  %s1104_s7 = sand.u32 1, %s974_s19  }
  0x1b   : > { %s280_s17 = scalar_lea.vmem %s1279_s0, %s777_s12  ;;  %850 = vset.pattern.permute.xlu0 %v993_v6  ;;  %s780_s8 = smul.u32 48, %s1104_s7 }
  0x1c   : > { %v851_v4 = vld [vmem:[%s280_s17 + $0x4] ss:$8 sps:$4 sm:$0xff]   ;;  %v853_v5 = vld [vmem:[%s280_s17] ss:$8 sps:$4 sm:$0xff]   ;;  %534 = vperm.xlu0 %850, %v297_v3   ;;  %539 = vperm.xlu1 %849, %v298_v2   ;;  %s591_s15 = scalar_lea.sflag [#allocation3], %s1104_s7  ;;  %s994_s17 = smov [#allocation2]  }
  0x1d   : > { %339 = vmatprep.subr.bf16.mxu0 %v851_v4  ;;  %778 = vmatprep.subr.bf16.mxu1 %v851_v4  ;;  %s1109_s9 = scalar_lea.vmem [#allocation2], %s780_s8  ;;  %s884_s24 = sshll.u32 %s994_s17, 4  ;;  %s885_s24 = int_to_ptr.vmem [resolvable:$false] %s884_s24 }
  0x1e   : > { %340 = vmatpush1.bf16.msra.mxu0 %v853_v5  ;;  %779 = vmatpush1.bf16.msra.mxu1 %v853_v5  ;;  %s611_s10 = sshll.u32 %s1109_s9, 4  ;;  %s886_s25 = scalar_lea.vmem %s885_s24, 1536  ;;  %s1114_s10 = int_to_ptr.vmem [resolvable:$true] %s611_s10 }
  0x1f   : > { %s880_s16 = scalar_lea.vmem %s1114_s10, 768  ;;  %p887_p1 = scmp.lt.s32.totalorder %s1114_s10, %s885_s24 }
  0x20   : > { %p881_p12 = scmp.ne.s32.totalorder %s1114_s10, %s880_s16  ;;  %p888_p2 = scmp.lt.s32.totalorder %s886_s25, %s880_s16 }
  0x21   : > { %770 = vmatmul.mubr.msk.bf16.vlgmr.msra.gmra.mrb[0].mxu0 %vm332_vm0, %v854_v7  ;;  %771 = vmatmul.mubr.msk.bf16.vlgmr.msra.gmra.mrb[0].mxu1 %vm332_vm0, %v855_v8 }
  0x22   : > { %p882_p13 = pnand %p881_p12, %p1068_p4  ;;  %p889_p3 = por %p888_p2, %p887_p1 }
  0x24   : > { %p883_p0 = pneg %p882_p13 }
  0x26   : > { %p890_p5 = pnand %p889_p3, %p883_p0 }
  0x92   : > { %v302_v9 = vpop.permute.xlu0 %301  ;;  %v312_v10 = vpop.permute.xlu1 %311 }
  0x96   : > { %v307_v11 = vpop.permute.xlu0 %306 }
  0xf4   : > { %v373_v12 = vpop.f32.mrb[0].mxu0  ;;  %v383_v13 = vpop.f32.mrb[0].mxu1 }
  0xf5   : > { %v374_v14 = vadd.f32 %v373_v12, %v302_v9  ;;  %v384_v15 = vadd.f32 %v383_v13, %v312_v10  ;;  %v375_v16 = vpop.f32.mrb[1].mxu0  ;;  %v385_v17 = vpop.f32.mrb[1].mxu1 }
  0xf6   : > { %v376_v18 = vadd.f32 %v375_v16, %v302_v9  ;;  %v386_v19 = vadd.f32 %v385_v17, %v312_v10  ;;  %v377_v20 = vpop.f32.mrb[2].mxu0  ;;  %v387_v21 = vpop.f32.mrb[2].mxu1 }
  0xf7   : > { %390 = vst [vmem:[%s1109_s9] sm:$0xff] %v374_v14  ;;  %v396_v22 = vsub.f32 0.0, %v374_v14  ;;  %394 = vst [vmem:[%s1109_s9 + $0x20] sm:$0xff] %v384_v15  ;;  %v400_v23 = vsub.f32 0.0, %v384_v15  ;;  %v378_v24 = vadd.f32 %v377_v20, %v307_v11  ;;  %v379_v25 = vpop.f32.mrb[3].mxu0  ;;  %v388_v26 = vpop.f32.mrb[3].mxu1 }
  0xf8   : > { %391 = vst [vmem:[%s1109_s9 + $0x8] sm:$0xff] %v376_v18  ;;  %v397_v27 = vsub.f32 0.0, %v376_v18  ;;  %395 = vst [vmem:[%s1109_s9 + $0x28] sm:$0xff] %v386_v19  ;;  %v401_v28 = vsub.f32 0.0, %v386_v19  ;;  %v380_v29 = vadd.f32 %v379_v25, %v307_v11 }
  0xf9   : > { %v402_v30 = vmul.f32 1.442695, %v396_v22  ;;  %v410_v31 = vmul.f32 1.442695, %v400_v23  ;;  %392 = vst [vmem:[%s1109_s9 + $0x10] sm:$0xff] %v378_v24  ;;  %v398_v32 = vsub.f32 0.0, %v378_v24 }
  0xfa   : > { %v404_v33 = vmul.f32 1.442695, %v397_v27  ;;  %v412_v34 = vmul.f32 1.442695, %v401_v28  ;;  %393 = vst [vmem:[%s1109_s9 + $0x18] sm:$0xff] %v380_v29  ;;  %v399_v35 = vsub.f32 0.0, %v380_v29 }
  0xfb   : > { %856 = vpow2.f32 %v402_v30  ;;  %v406_v36 = vmul.f32 1.442695, %v398_v32 }
  0xfc   : > { %893 = shalt.err (!%p890_p5)
}
  0xfd   : > { %s894_s27 = scalar_lea.hbm %s1124_s14, 768  ;;  %s898_s12 = scalar_lea.hbm %s1283_s4, 1536 }
  0xfe   : > { %p895_p6 = scmp.ne.s32.totalorder %s1124_s14, %s894_s27  ;;  %p899_p10 = scmp.lt.u32.totalorder %s1124_s14, %s1283_s4 }
  0xff   : > { %p900_p11 = scmp.lt.u32.totalorder %s898_s12, %s894_s27  ;;  %p902_p13 = scmp.lt.u32.totalorder %s894_s27, %s1124_s14 }
 0x100   : > { %p896_p7 = pnand %p895_p6, %p1068_p4 }
 0x101   : > { %p901_p12 = por %p900_p11, %p899_p10 }
 0x102   : > { %p897_p9 = pneg %p896_p7 }
 0x103   : > { %p903_p0 = por %p902_p13, %p901_p12 }
 0x105   : > { %p904_p1 = pnand %p903_p0, %p897_p9 }
 0x107   : > { %907 = shalt.err (!%p904_p1)
}
 0x108   : > { %s995_s16 = smov 256   ;;  %s996_s24 = smov 16   ;;  %858 = vpow2.f32 %v410_v31  ;;  %v408_v37 = vmul.f32 1.442695, %v399_v35  ;;  %v426_v38 = vlaneseq  ;;  %v857_v40 = vpop.eup %856  ;;  %v530_v0 = vpop.permute.xlu1 %529 }
 0x109   : > { %783 = dma.vmem_to_hbm [thread:$0]  (%p1068_p4), %s1114_s10, 768, %s1124_s14, %s591_s15, %s995_s16, %s995_s16, %s996_s24   ;;  %860 = vpow2.f32 %v404_v33  ;;  %v414_v42 = vadd.f32 1.0, %v857_v40 }
 0x10a   : > { %862 = vpow2.f32 %v412_v34  ;;  %v427_v39 = vshrl.u32 %v426_v38, 7  ;;  %v469_v52 = vld [vmem:[%s1282_s3] ss:$2 sm:$0x3]  ;;  %s271_s27 = scalar_lea.vmem [#allocation4], %s780_s8  ;;  %s1226_s12 = scalar_lea.hbm %s1284_s5, %s781_s11 }
 0x10b   : > { %864 = vpow2.f32 %v406_v36  ;;  %v772_v57 = vld [vmem:[%s1282_s3 + $0x1] ss:$2 sm:$0x3]  ;;  %s629_s8 = sshll.u32 %s271_s27, 4  ;;  %s596_s13 = scalar_lea.sflag [#allocation5], %s1104_s7  ;;  %s1228_s8 = int_to_ptr.vmem [resolvable:$true] %s629_s8 }
 0x10c   : > { %866 = vpow2.f32 %v408_v37  ;;  %v429_v45 = vadd.s32 16, %v427_v39  ;;  %v481_v48 = vsub.s32 0, %v427_v39  ;;  %v485_v49 = vsub.s32 1, %v427_v39  ;;  %v540_v10 = vpop.permute.xlu1 %539  ;;  %s908_s17 = scalar_lea.vmem %s1228_s8, 768  ;;  %s997_s21 = smov [#allocation4]  }
 0x10d   : > { %868 = vrcp.f32 %v414_v42  ;;  %v428_v53 = vadd.s32 8, %v427_v39  ;;  %v1158_v56 = vand.u32 7, %v427_v39  ;;  %v535_v39 = vpop.permute.xlu0 %534  ;;  %p909_p2 = scmp.ne.s32.totalorder %s1228_s8, %s908_s17  ;;  %s912_s10 = sshll.u32 %s997_s21, 4  ;;  %s913_s10 = int_to_ptr.vmem [resolvable:$false] %s912_s10 }
 0x10e   : > { %v1163_v59 = vand.u32 7, %v429_v45  ;;  %v482_v60 = vrot.slane %v469_v52, %v481_v48  ;;  %v486_v61 = vrot.slane %v469_v52, %v485_v49  ;;  %v493_v62 = vrot.slane %v772_v57, %v481_v48  ;;  %s914_s11 = scalar_lea.vmem %s913_s10, 1536  ;;  %p915_p6 = scmp.lt.s32.totalorder %s1228_s8, %s913_s10 }
 0x10f   : > { %v497_v63 = vrot.slane %v772_v57, %v485_v49  ;;  %v1165_v1 = vand.u32 7, %v428_v53  ;;  %vm466_vm1 = vcmp.eq.s32.totalorder %v1158_v56, 0  ;;  %vm548_vm3 = vcmp.lt.s32.totalorder %v1158_v56, 2  ;;  %p910_p3 = pnand %p909_p2, %p1068_p4  ;;  %p916_p7 = scmp.lt.s32.totalorder %s914_s11, %s908_s17 }
 0x110   : > { %vm468_vm2 = vcmp.eq.s32.totalorder %v1163_v59, 0  ;;  %vm551_vm4 = vcmp.ge.s32.totalorder %v1158_v56, 2  ;;  %vm554_vm5 = vcmp.lt.s32.totalorder %v1158_v56, 4  ;;  %v500_v2 = vsel %vm466_vm1, %v482_v60, %v493_v62 }
 0x111   : > { %v501_v3 = vsel %vm466_vm1, %v486_v61, %v497_v63  ;;  %vm553_vm6 = vcmp.ge.s32.totalorder %v1163_v59, 2  ;;  %vm467_vm7 = vcmp.eq.s32.totalorder %v1165_v1, 0  ;;  %v504_v5 = vsel %vm468_vm2, %v482_v60, %v493_v62  ;;  %vm1182_vm12 = vmand %vm551_vm4, %vm554_vm5  ;;  %p911_p5 = pneg %p910_p3  ;;  %p917_p9 = por %p916_p7, %p915_p6 }
 0x112   : > { %v859_v41 = vpop.eup %858  ;;  %v505_v6 = vsel %vm468_vm2, %v486_v61, %v497_v63  ;;  %vm550_vm8 = vcmp.lt.s32.totalorder %v1163_v59, 2  ;;  %vm556_vm9 = vcmp.lt.s32.totalorder %v1163_v59, 4  ;;  %vm552_vm10 = vcmp.ge.s32.totalorder %v1165_v1, 2 }
 0x113   : > { %v861_v43 = vpop.eup %860  ;;  %v418_v44 = vadd.f32 1.0, %v859_v41  ;;  %vm555_vm11 = vcmp.lt.s32.totalorder %v1165_v1, 4  ;;  %v502_v15 = vsel %vm467_vm7, %v482_v60, %v493_v62  ;;  %v503_v16 = vsel %vm467_vm7, %v486_v61, %v497_v63  ;;  %vm1194_vm13 = vmand %vm553_vm6, %vm556_vm9  ;;  %p918_p10 = pnand %p917_p9, %p911_p5 }
 0x114   : > { %v863_v46 = vpop.eup %862  ;;  %v415_v47 = vadd.f32 1.0, %v861_v43  ;;  %vm558_vm14 = vmand %vm552_vm10, %vm555_vm11  ;;  %vm549_vm15 = vcmp.lt.s32.totalorder %v1165_v1, 2 }
 0x115   : > { %v865_v50 = vpop.eup %864  ;;  %870 = vrcp.f32 %v418_v44  ;;  %v419_v51 = vadd.f32 1.0, %v863_v46 }
 0x116   : > { %v867_v54 = vpop.eup %866  ;;  %872 = vrcp.f32 %v415_v47  ;;  %v416_v55 = vadd.f32 1.0, %v865_v50 }
 0x117   : > { %874 = vrcp.f32 %v419_v51  ;;  %v417_v58 = vadd.f32 1.0, %v867_v54  ;;  %v869_v4 = vpop.eup %868 }
 0x118   : > { %876 = vrcp.f32 %v416_v55  ;;  %v506_v8 = vmul.f32 16.0, %v869_v4  ;;  %v518_v9 = vmul.f32 %v869_v4, %v869_v4 }
 0x119   : > { %878 = vrcp.f32 %v417_v58 }
 0x11a   : > { %v512_v19 = vadd.f32 %v506_v8, %v500_v2  ;;  %v542_v21 = vmul.f32 %v530_v0, %v518_v9 }
 0x11c   : > { %v566_v31 = vsel %vm1182_vm12, %v542_v21, %v869_v4 }
 0x11d   : > { %v578_v33 = vsel %vm548_vm3, %v512_v19, %v566_v31 }
 0x11e   : > { %584 = vst [vmem:[%s271_s27] sm:$0xff] %v578_v33 }
 0x11f   : > { %v871_v7 = vpop.eup %870 }
 0x120   : > { %v873_v11 = vpop.eup %872  ;;  %v510_v13 = vmul.f32 16.0, %v871_v7  ;;  %v522_v14 = vmul.f32 %v871_v7, %v871_v7 }
 0x121   : > { %v875_v17 = vpop.eup %874  ;;  %v507_v18 = vmul.f32 16.0, %v873_v11  ;;  %v519_v20 = vmul.f32 %v873_v11, %v873_v11 }
 0x122   : > { %v877_v23 = vpop.eup %876  ;;  %v511_v24 = vmul.f32 16.0, %v875_v17  ;;  %v516_v25 = vadd.f32 %v510_v13, %v504_v5  ;;  %v523_v26 = vmul.f32 %v875_v17, %v875_v17  ;;  %v546_v27 = vmul.f32 %v540_v10, %v522_v14 }
 0x123   : > { %v879_v28 = vpop.eup %878  ;;  %v513_v29 = vadd.f32 %v507_v18, %v501_v3  ;;  %v543_v30 = vmul.f32 %v530_v0, %v519_v20  ;;  %v508_v32 = vmul.f32 16.0, %v877_v23  ;;  %v520_v43 = vmul.f32 %v877_v23, %v877_v23 }
 0x124   : > { %v517_v34 = vadd.f32 %v511_v24, %v505_v6  ;;  %v547_v35 = vmul.f32 %v540_v10, %v523_v26  ;;  %v570_v36 = vsel %vm1194_vm13, %v546_v27, %v871_v7  ;;  %v509_v40 = vmul.f32 16.0, %v879_v28 }
 0x125   : > { %v567_v37 = vsel %vm1182_vm12, %v543_v30, %v873_v11  ;;  %v582_v38 = vsel %vm550_vm8, %v516_v25, %v570_v36  ;;  %v521_v44 = vmul.f32 %v879_v28, %v879_v28  ;;  %v514_v46 = vadd.f32 %v508_v32, %v502_v15 }
 0x126   : > { %v579_v41 = vsel %vm548_vm3, %v513_v29, %v567_v37  ;;  %v571_v42 = vsel %vm1194_vm13, %v547_v35, %v875_v17  ;;  %588 = vst [vmem:[%s271_s27 + $0x20] sm:$0xff] %v582_v38  ;;  %v515_v47 = vadd.f32 %v509_v40, %v503_v16  ;;  %v544_v48 = vmul.f32 %v535_v39, %v520_v43 }
 0x127   : > { %585 = vst [vmem:[%s271_s27 + $0x8] sm:$0xff] %v579_v41  ;;  %v583_v45 = vsel %vm550_vm8, %v517_v34, %v571_v42  ;;  %v545_v49 = vmul.f32 %v535_v39, %v521_v44 }
 0x128   : > { %589 = vst [vmem:[%s271_s27 + $0x28] sm:$0xff] %v583_v45  ;;  %v568_v50 = vsel %vm558_vm14, %v544_v48, %v877_v23 }
 0x129   : > { %v569_v51 = vsel %vm558_vm14, %v545_v49, %v879_v28  ;;  %v580_v52 = vsel %vm549_vm15, %v514_v46, %v568_v50 }
 0x12a   : > { %v581_v53 = vsel %vm549_vm15, %v515_v47, %v569_v51  ;;  %586 = vst [vmem:[%s271_s27 + $0x10] sm:$0xff] %v580_v52 }
 0x12b   : > { %587 = vst [vmem:[%s271_s27 + $0x18] sm:$0xff] %v581_v53 }
 0x12c   : > { %921 = shalt.err (!%p918_p10)
}
 0x12d   : > { %s922_s14 = scalar_lea.hbm %s1226_s12, 768  ;;  %s926_s27 = scalar_lea.hbm %s1284_s5, 1536 }
 0x12e   : > { %p923_p11 = scmp.ne.s32.totalorder %s1226_s12, %s922_s14  ;;  %p927_p0 = scmp.lt.u32.totalorder %s1226_s12, %s1284_s5 }
 0x12f   : > { %p928_p1 = scmp.lt.u32.totalorder %s926_s27, %s922_s14  ;;  %p930_p3 = scmp.lt.u32.totalorder %s922_s14, %s1226_s12 }
 0x130   : > { %p924_p12 = pnand %p923_p11, %p1068_p4 }
 0x131   : > { %p929_p2 = por %p928_p1, %p927_p0 }
 0x132   : > { %p925_p13 = pneg %p924_p12 }
 0x133   : > { %p931_p5 = por %p930_p3, %p929_p2 }
 0x135   : > { %p932_p6 = pnand %p931_p5, %p925_p13 }
 0x137   : > { %935 = shalt.err (!%p932_p6)
}
 0x138   : > { %784 = dma.vmem_to_hbm [thread:$0]  (%p1068_p4), %s1228_s8, 768, %s1226_s12, %s596_s13, %s995_s16, %s995_s16, %s996_s24  }
 0x139 PF: > { %p794_p7 = scmp.ge.s32.totalorder %s990_s23, 2  ;;  %s644_s17 = sand.u32 1, %s970_s18  }
 0x13a   : > { %s645_s21 = scalar_lea.sflag [#allocation3], %s644_s17 }
 0x13b   : > { %p788_p9 = pnand %p794_p7, %p1075_p8 }
 0x13d   : > { %961 = dma.done.wait (!%p788_p9), %s645_s21, 768  }
 0x13e   : > { %963 = vsyncadd (!%p788_p9), %s645_s21, 4294966528  ;;  %s654_s28 = scalar_lea.sflag [#allocation5], %s644_s17 }
 0x13f   : > { %965 = dma.done.wait (!%p788_p9), %s654_s28, 768  }
 0x140   : > { %967 = vsyncadd (!%p788_p9), %s654_s28, 4294966528  ;;  %s22_s23 = sadd.s32 1, %s990_s23   ;;  %s1291_s18 = smov %s974_s19 }
 0x141   : > { %p19_p10 = scmp.ge.s32.totalorder %s22_s23, 4   ;;  %s1292_s19 = smov %s978_s20 }
 0x142   : > { %s1293_s20 = smov %s1081_s6  ;;  %s1294_s21 = smov %s986_s22 }
 0x143   : > { %s1295_s22 = smov %s1297_s26  ;;  %21 = sbr.rel (!%p19_p10) target bundleno = 6 (0x6), region = 92 }
 0x14a   :  { %659 = vsyncpa [#allocation3], 1 }
 0x14b   :  { %661 = vsyncpa [#allocation3 + $0x1], 1 }
 0x14c   :  { %662 = vsyncpa [#allocation5], 1 }
 0x14d   :  { %664 = vsyncpa [#allocation5 + $0x1], 1 }

</bundles_post_ra>
